<compile_context>
chip_gen: v5e
topology: v5e:2x2
jax: 0.10.0
libtpu: 0.0.40
codegen_flags: <defaults>
</compile_context>

<pallas_src>
import jax
import jax.numpy as jnp
from jax import lax
from jax.experimental import pallas as pl
from jax.experimental.pallas import tpu as pltpu


def _proj_kernel(x_ref, w_ref, b_ref, o_ref, acc_ref):
    # x_ref:  (TM, TK)  tile of flattened tokens
    # w_ref:  (TN, TK)  tile of W in PyTorch (out, in) layout
    # b_ref:  (1,  TN)  bias tile
    # o_ref:  (TM, TN)  output tile
    # acc_ref:(TM, TN)  f32 accumulator (VMEM scratch, resident across K)
    k = pl.program_id(2)

    @pl.when(k == 0)
    def _():
        acc_ref[...] = jnp.zeros_like(acc_ref)

    # x @ W^T : contract last dim of x with last dim of w (no transpose op).
    acc_ref[...] += lax.dot_general(
        x_ref[...], w_ref[...],
        dimension_numbers=(((1,), (1,)), ((), ())),
        preferred_element_type=jnp.float32,
    )

    @pl.when(k == pl.num_programs(2) - 1)
    def _():
        o_ref[...] = (
            acc_ref[...] + b_ref[...].astype(jnp.float32)
        ).astype(o_ref.dtype)


def _pick_tile(dim, candidates):
    """Largest candidate tile that evenly divides `dim`; else full extent."""
    for t in candidates:
        if dim >= t and dim % t == 0:
            return t
    return dim


def multi_head_split_forward(x, weight, bias, num_heads):
    """x: (B, S, D); weight: (D, D) in PyTorch (out, in) layout; bias: (D,)."""
    B, S, D = x.shape
    head_dim = D // num_heads
    M = B * S

    x2d = x.reshape(M, D)          # flatten tokens (metadata only)
    b2d = bias.reshape(1, D)

    # Tile sizes: 128-multiples when possible (MXU/lane aligned), else full dim.
    tm = _pick_tile(M, (512, 256, 128))
    tn = _pick_tile(D, (256, 128))
    tk = _pick_tile(D, (512, 256, 128))

    grid = (M // tm, D // tn, D // tk)

    dtype_bytes = jnp.dtype(x.dtype).itemsize
    # Per-step working set: double-buffered x/w/bias/output tiles + f32 acc.
    working_set = (
        2 * (tm * tk + tn * tk + tn) * dtype_bytes
        + 2 * tm * tn * dtype_bytes
        + tm * tn * 4
    )
    vmem_limit = int(min(64 * 2**20, max(16 * 2**20, 4 * working_set)))

    cost = pl.CostEstimate(
        flops=2 * M * D * D,
        transcendentals=0,
        bytes_accessed=(M * D + D * D + D + M * D) * dtype_bytes,
    )

    y = pl.pallas_call(
        _proj_kernel,
        out_shape=jax.ShapeDtypeStruct((M, D), x.dtype),
        grid_spec=pltpu.PrefetchScalarGridSpec(
            num_scalar_prefetch=0,
            grid=grid,
            in_specs=[
                pl.BlockSpec((tm, tk), lambda i, j, k: (i, k)),   # x tile
                pl.BlockSpec((tn, tk), lambda i, j, k: (j, k)),   # W (out,in) tile
                pl.BlockSpec((1, tn), lambda i, j, k: (0, j)),    # bias tile
            ],
            out_specs=pl.BlockSpec((tm, tn), lambda i, j, k: (i, j)),
            scratch_shapes=[pltpu.VMEM((tm, tn), jnp.float32)],
        ),
        compiler_params=pltpu.CompilerParams(
            dimension_semantics=("parallel", "parallel", "arbitrary"),
            vmem_limit_bytes=vmem_limit,
        ),
        cost_estimate=cost,
    )(x2d, weight, b2d)

    # Per-head split is pure metadata; keep it outside the kernel so stores
    # stay lane-dense (head_dim may be < 128).
    return y.reshape(B * S * num_heads, head_dim)


if __name__ == "__main__":
    # Small shapes consistent with the module.
    B, S, D = 2, 8, 32
    num_heads = 4
    head_dim = D // num_heads

    key = jax.random.PRNGKey(0)
    kx, kw, kb = jax.random.split(key, 3)

    x = jax.random.normal(kx, (B, S, D), dtype=jnp.float32)
    # PyTorch Linear default init: U(-1/sqrt(D), 1/sqrt(D)); weight is (out, in).
    bound = 1.0 / (D ** 0.5)
    weight = jax.random.uniform(kw, (D, D), minval=-bound, maxval=bound,
                                dtype=jnp.float32)
    bias = jax.random.uniform(kb, (D,), minval=-bound, maxval=bound,
                              dtype=jnp.float32)

    out = multi_head_split_forward(x, weight, bias, num_heads)
    out = jax.block_until_ready(out)

    # Reference check in plain JAX.
    ref = (x.reshape(B * S, D) @ weight.T + bias).reshape(
        B * S * num_heads, head_dim)
    assert out.shape == (B * S * num_heads, head_dim), out.shape
    assert jnp.allclose(out, ref, atol=1e-5, rtol=1e-5)

    print("KERNEL_OK")
</pallas_src>

<mosaic_0001>
module attributes {stable_mosaic.version = 11 : i64} {
  func.func @_proj_kernel(%arg0: i32, %arg1: i32, %arg2: i32, %arg3: memref<16x32xf32, #tpu.memory_space<vmem>>, %arg4: memref<32x32xf32, #tpu.memory_space<vmem>>, %arg5: memref<1x32xf32, #tpu.memory_space<vmem>>, %arg6: memref<16x32xf32, #tpu.memory_space<vmem>>, %arg7: memref<16x32xf32, #tpu.memory_space<vmem>>) attributes {dimension_semantics = [#tpu.dimension_semantics<parallel>, #tpu.dimension_semantics<parallel>, #tpu.dimension_semantics<arbitrary>], iteration_bounds = array<i64: 1, 1, 1>, scalar_prefetch = 0 : i64, scratch_operands = 1 : i64, tpu.core_type = #tpu.core_type<tc>, window_params = [{transform_indices = @transform_0, window_bounds = array<i64: 16, 32>}, {transform_indices = @transform_1, window_bounds = array<i64: 32, 32>}, {transform_indices = @transform_2, window_bounds = array<i64: 1, 32>}, {transform_indices = @transform_3, window_bounds = array<i64: 16, 32>}]} {
    %c0_i32 = arith.constant 0 : i32
    %0 = arith.cmpi eq, %arg2, %c0_i32 : i32
    %1 = arith.extui %0 : i1 to i32
    %c0_i32_0 = arith.constant 0 : i32
    %2 = arith.cmpi ne, %1, %c0_i32_0 : i32
    scf.if %2 {
      %cst_10 = arith.constant 0.000000e+00 : f32
      %12 = vector.broadcast %cst_10 : f32 to vector<16x32xf32>
      %c0_11 = arith.constant 0 : index
      %c0_12 = arith.constant 0 : index
      %13 = vector.load %arg7[%c0_11, %c0_12] : memref<16x32xf32, #tpu.memory_space<vmem>>, vector<16x32xf32>
      tpu.vector_store %arg7[%c0_11, %c0_12], %12 {strides = array<i32>} : memref<16x32xf32, #tpu.memory_space<vmem>>, vector<16x32xf32>,
    } else {
    }
    %c0 = arith.constant 0 : index
    %c0_1 = arith.constant 0 : index
    %3 = vector.load %arg7[%c0, %c0_1] : memref<16x32xf32, #tpu.memory_space<vmem>>, vector<16x32xf32>
    %c0_2 = arith.constant 0 : index
    %c0_3 = arith.constant 0 : index
    %4 = vector.load %arg3[%c0_2, %c0_3] : memref<16x32xf32, #tpu.memory_space<vmem>>, vector<16x32xf32>
    %c0_4 = arith.constant 0 : index
    %c0_5 = arith.constant 0 : index
    %5 = vector.load %arg4[%c0_4, %c0_5] : memref<32x32xf32, #tpu.memory_space<vmem>>, vector<32x32xf32>
    %cst = arith.constant dense<0.000000e+00> : vector<16x32xf32>
    %6 = tpu.matmul %4, %5, %cst {dimension_numbers = #tpu.dot_dimension_numbers<[1], [1], [0], [0], [0, 0, 1, 0], [], []>} : vector<16x32xf32>, vector<32x32xf32>, vector<16x32xf32> -> vector<16x32xf32>
    %7 = arith.addf %3, %6 : vector<16x32xf32>
    %c0_6 = arith.constant 0 : index
    %c0_7 = arith.constant 0 : index
    %8 = vector.load %arg7[%c0_6, %c0_7] : memref<16x32xf32, #tpu.memory_space<vmem>>, vector<16x32xf32>
    tpu.vector_store %arg7[%c0_6, %c0_7], %7 {strides = array<i32>} : memref<16x32xf32, #tpu.memory_space<vmem>>, vector<16x32xf32>,
    %c0_i32_8 = arith.constant 0 : i32
    %9 = arith.cmpi eq, %arg2, %c0_i32_8 : i32
    %10 = arith.extui %9 : i1 to i32
    %c0_i32_9 = arith.constant 0 : i32
    %11 = arith.cmpi ne, %10, %c0_i32_9 : i32
    scf.if %11 {
      %c0_10 = arith.constant 0 : index
      %c0_11 = arith.constant 0 : index
      %12 = vector.load %arg7[%c0_10, %c0_11] : memref<16x32xf32, #tpu.memory_space<vmem>>, vector<16x32xf32>
      %c0_12 = arith.constant 0 : index
      %c0_13 = arith.constant 0 : index
      %13 = vector.load %arg5[%c0_12, %c0_13] : memref<1x32xf32, #tpu.memory_space<vmem>>, vector<1x32xf32>
      %14 = vector.broadcast %13 : vector<1x32xf32> to vector<16x32xf32>
      %15 = arith.addf %12, %14 : vector<16x32xf32>
      %c0_14 = arith.constant 0 : index
      %c0_15 = arith.constant 0 : index
      %16 = vector.load %arg6[%c0_14, %c0_15] : memref<16x32xf32, #tpu.memory_space<vmem>>, vector<16x32xf32>
      tpu.vector_store %arg6[%c0_14, %c0_15], %15 {strides = array<i32>} : memref<16x32xf32, #tpu.memory_space<vmem>>, vector<16x32xf32>,
    } else {
    }
    return
  }
  func.func @transform_0(%arg0: i32, %arg1: i32, %arg2: i32) -> (i32, i32) {
    %c0_i32 = arith.constant 0 : i32
    return %arg0, %arg2 : i32, i32
  }
  func.func @transform_1(%arg0: i32, %arg1: i32, %arg2: i32) -> (i32, i32) {
    %c0_i32 = arith.constant 0 : i32
    return %arg1, %arg2 : i32, i32
  }
  func.func @transform_2(%arg0: i32, %arg1: i32, %arg2: i32) -> (i32, i32) {
    %c0_i32 = arith.constant 0 : i32
    %c0_i32_0 = arith.constant 0 : i32
    return %c0_i32, %arg1 : i32, i32
  }
  func.func @transform_3(%arg0: i32, %arg1: i32, %arg2: i32) -> (i32, i32) {
    %c0_i32 = arith.constant 0 : i32
    return %arg0, %arg1 : i32, i32
  }
}

</mosaic_0001>

<bundles_post_ra>
// kernel: tpu_custom_call.1
= control target key start
LH: loop header
LB: loop body
LE: loop exit
PB: predicated region body
PF: predicated region fallthrough
CT: control target
= control target key end

     0   :  { %8 = vsyncpa [#allocation4], 0  ;;  %s299_s0 = inlined_call_operand.hbm [shape: f32[16,32], index: 0, kind: input, shape index: {}]   ;;  %s300_s1 = inlined_call_operand.hbm [shape: f32[32,32], index: 1, kind: input, shape index: {}]   ;;  %s301_s2 = inlined_call_operand.vmem [shape: f32[1,32], index: 2, kind: input, shape index: {}]   ;;  %s302_s3 = inlined_call_operand.hbm [shape: f32[16,32], index: 3, kind: output, shape index: {}]  }
   0x1   :  { %9 = vsyncpa [#allocation7], 0 }
   0x2   :  { %10 = vsyncpa [#allocation5], 0  ;;  %s15_s14 = sshll.u32 %s299_s0, 4  ;;  %s236_s15 = smov [#allocation3]   ;;  %s16_s14 = int_to_ptr.hbm [resolvable:$true] %s15_s14 }
   0x3   :  { %s17_s16 = sshll.u32 %s236_s15, 4  ;;  %s28_s19 = sshll.u32 %s300_s1, 4  ;;  %s18_s16 = int_to_ptr.vmem [resolvable:$true] %s17_s16  ;;  %s29_s19 = int_to_ptr.hbm [resolvable:$true] %s28_s19 }
   0x4   :  { %s237_s20 = smov 128   ;;  %s238_s21 = smov 8  }
   0x5   :  { %23 = dma.hbm_to_vmem [thread:$0]  %s16_s14, 256, %s18_s16, [#allocation4], %s237_s20, %s237_s20, %s238_s21  }
   0x6   :  { %s239_s22 = smov [#allocation6]  }
   0x7   :  { %s30_s23 = sshll.u32 %s239_s22, 4  ;;  %s31_s23 = int_to_ptr.vmem [resolvable:$true] %s30_s23 }
   0x8   :  { %36 = dma.hbm_to_vmem [thread:$0]  %s29_s19, 512, %s31_s23, [#allocation7], %s237_s20, %s237_s20, %s238_s21  }
   0x9   :  { %230 = dma.done.wait [#allocation4], 256  }
   0xa   :  { %231 = vsyncadd [#allocation4], 4294967040 }
   0xb   :  { %232 = dma.done.wait [#allocation7], 512  }
   0xc   :  { %233 = vsyncadd [#allocation7], 4294966784  ;;  %vm51_vm0 = vcmask 261120   ;;  %v240_v0 = vmov 0.0   ;;  %v61_v1 = vld [vmem:[#allocation6 + $0x18] sm:$0xff]  ;;  %v60_v2 = vld [vmem:[#allocation6 + $0x10] sm:$0xff] }
   0xd   :  { %52 = vst.msk [vmem:[#allocation2] sm:$0xff] %vm51_vm0, %v240_v0  ;;  %141 = vmatpush.xpose.msk.msra.mxu0 %vm51_vm0, %v61_v1  ;;  %147 = vmatpush.xpose.msk.msra.mxu1 %vm51_vm0, %v61_v1  ;;  %v59_v3 = vld [vmem:[#allocation6 + $0x8] sm:$0xff]  ;;  %v58_v4 = vld [vmem:[#allocation6] sm:$0xff]  ;;  %v56_v5 = vld [vmem:[#allocation3] sm:$0xff]  ;;  %s241_s24 = smov [#allocation8]   ;;  %s127_s28 = sshll.u32 %s302_s3, 4  ;;  %s128_s28 = int_to_ptr.hbm [resolvable:$true] %s127_s28 }
   0xe   :  { %53 = vst.msk [vmem:[#allocation2 + $0x8] sm:$0xff] %vm51_vm0, %v240_v0  ;;  %v57_v6 = vld [vmem:[#allocation3 + $0x8] sm:$0xff]  ;;  %v157_v13 = vld [vmem:[%s301_s2] ss:$0 sm:$0xff]  ;;  %s125_s25 = sshll.u32 %s241_s24, 4  ;;  %s126_s25 = int_to_ptr.vmem [resolvable:$true] %s125_s25 }
  0x11   :  { %142 = vmatpush.xpose.msk.msra.mxu0 %vm51_vm0, %v60_v2  ;;  %148 = vmatpush.xpose.msk.msra.mxu1 %vm51_vm0, %v60_v2 }
  0x14   :  { %v54_v7 = vld [vmem:[#allocation2] sm:$0xff] }
  0x15   :  { %143 = vmatpush.xpose.msk.msra.mxu0 %vm51_vm0, %v59_v3  ;;  %149 = vmatpush.xpose.msk.msra.mxu1 %vm51_vm0, %v59_v3  ;;  %v55_v8 = vld [vmem:[#allocation2 + $0x8] sm:$0xff] }
  0x19   :  { %144 = vmatpush.xpose.msk.msra.mxu0 %vm51_vm0, %v58_v4  ;;  %150 = vmatpush.xpose.msk.msra.mxu1 %vm51_vm0, %v58_v4 }
  0x1c   :  { %145 = vmatmul.msk.f32.vlgmr.msra.gmra.mxu0 %vm51_vm0, %v56_v5  ;;  %146 = vmatmul.msk.f32.vlgmr.msra.gmra.mxu1 %vm51_vm0, %v57_v6 }
  0x99   :  { %v98_v9 = vpop.f32.mrf.mxu0  ;;  %v101_v10 = vpop.f32.mrf.mxu1 }
  0x9a   :  { %v104_v11 = vadd.f32 %v98_v9, %v54_v7  ;;  %v105_v12 = vadd.f32 %v101_v10, %v55_v8 }
  0x9c   :  { %106 = vst.msk [vmem:[#allocation2] sm:$0xff] %vm51_vm0, %v104_v11 }
  0x9d   :  { %107 = vst.msk [vmem:[#allocation2 + $0x8] sm:$0xff] %vm51_vm0, %v105_v12 }
  0xa3   :  { %v111_v14 = vld [vmem:[#allocation2] sm:$0xff] }
  0xa4   :  { %v112_v15 = vld [vmem:[#allocation2 + $0x8] sm:$0xff]  ;;  %v117_v16 = vadd.f32 %v157_v13, %v111_v14 }
  0xa5   :  { %v118_v17 = vadd.f32 %v157_v13, %v112_v15 }
  0xa6   :  { %119 = vst.msk [vmem:[#allocation8] sm:$0xff] %vm51_vm0, %v117_v16 }
  0xa7   :  { %120 = vst.msk [vmem:[#allocation8 + $0x8] sm:$0xff] %vm51_vm0, %v118_v17 }
  0xa8   :  { %133 = dma.vmem_to_hbm [thread:$0]  %s126_s25, 256, %s128_s28, [#allocation5], %s237_s20, %s237_s20, %s238_s21  }
  0xa9   :  { %234 = dma.done.wait [#allocation5], 256  }
  0xaa   :  { %235 = vsyncadd [#allocation5], 4294967040 }
  0xab   :  { %138 = vsyncpa [#allocation4], 1 }
  0xac   :  { %139 = vsyncpa [#allocation7], 1 }
  0xad   :  { %140 = vsyncpa [#allocation5], 1 }

</bundles_post_ra>
